<compile_context>
chip_gen: v7x
topology: tpu7x:2x2x1
jax: 0.10.0
libtpu: 0.0.40
codegen_flags: <defaults>
</compile_context>

<pallas_src>
import jax
import jax.numpy as jnp
from jax.experimental import pallas as pl
from jax.experimental.pallas import tpu as pltpu

IN_FEATURES = 28 * 28   # 784
HIDDEN1 = 600
HIDDEN2 = 100


def _round_up(n, m):
    return ((n + m - 1) // m) * m


# Lane-padded feature dims (fixed for this model).
H1P = _round_up(HIDDEN1, 128)   # 640
H2P = _round_up(HIDDEN2, 128)   # 128


def mlp_kernel(x_ref, w1_ref, w2_ref, w3_ref, o_ref):
    # x_ref : (TB, 784) f32  (cast to bf16 in-kernel, hidden under MXU)
    # w1_ref: (784, 640) bf16, w2_ref: (640, 128) bf16, w3_ref: (128, CP) bf16
    # o_ref : (TB, CP) f32
    x = x_ref[...].astype(jnp.bfloat16)
    h1 = jnp.dot(x, w1_ref[...], preferred_element_type=jnp.float32)
    h1 = jnp.maximum(h1, 0.0).astype(jnp.bfloat16)
    h2 = jnp.dot(h1, w2_ref[...], preferred_element_type=jnp.float32)
    h2 = jnp.maximum(h2, 0.0).astype(jnp.bfloat16)
    o_ref[...] = jnp.dot(h2, w3_ref[...], preferred_element_type=jnp.float32)


def prepare_weights(w1, w2, w3):
    """One-time weight staging: cast to bf16 and zero-pad feature dims to lane
    multiples.  Call once (outside the per-step forward); zero padding is exact.

    w1 (784, 600) -> (784, 640), w2 (600, 100) -> (640, 128), w3 (100, C) -> (128, CP).
    """
    C = w3.shape[1]
    CP = _round_up(C, 128)
    w1p = jnp.pad(w1.astype(jnp.bfloat16), ((0, 0), (0, H1P - HIDDEN1)))
    w2p = jnp.pad(w2.astype(jnp.bfloat16), ((0, H1P - HIDDEN1), (0, H2P - HIDDEN2)))
    w3p = jnp.pad(w3.astype(jnp.bfloat16), ((0, H2P - HIDDEN2), (0, CP - C)))
    return w1p, w2p, w3p, C


def _vmem_limit_bytes(TB, CP):
    # x double-buffer (f32) + resident weights (bf16, double-buffered by default)
    # + output double-buffer (f32) + rough f32 intermediate staging, 1.5x headroom.
    x_b = 2 * TB * IN_FEATURES * 4
    w_b = 2 * 2 * (IN_FEATURES * H1P + H1P * H2P + H2P * CP)
    o_b = 2 * TB * CP * 4
    tmp = TB * (2 * H1P + 2 * H2P + CP) * 4
    total = int(1.5 * (x_b + w_b + o_b + tmp)) + (4 << 20)
    return max(16 << 20, min(total, 48 << 20))


def mnist_fully_connected_forward(x, w1p, w2p, w3p, num_classes, *, tb=1024):
    """x: (B, 1, 28, 28) or (B, 784) float32.  w1p/w2p/w3p from prepare_weights().
    Returns (B, num_classes) f32 logits."""
    x2d = x.reshape(-1, IN_FEATURES)
    B = x2d.shape[0]
    CP = w3p.shape[1]

    # Batch tile: multiple of 8 (sublane), capped at `tb`, and capped at
    # ceil(B/2) so the grid has >= 2 steps whenever B > 8 (v7x megacore).
    TB = min(tb, max(8, _round_up((B + 1) // 2, 8)))
    B_pad = _round_up(B, TB)
    if B_pad != B:
        x2d = jnp.pad(x2d, ((0, B_pad - B), (0, 0)))
    grid = (B_pad // TB,)

    out_padded = pl.pallas_call(
        mlp_kernel,
        out_shape=jax.ShapeDtypeStruct((B_pad, CP), jnp.float32),
        grid_spec=pltpu.PrefetchScalarGridSpec(
            num_scalar_prefetch=0,
            grid=grid,
            in_specs=[
                pl.BlockSpec((TB, IN_FEATURES), lambda i: (i, 0)),   # x tile per step
                pl.BlockSpec((IN_FEATURES, H1P), lambda i: (0, 0)),  # weights resident
                pl.BlockSpec((H1P, H2P), lambda i: (0, 0)),
                pl.BlockSpec((H2P, CP), lambda i: (0, 0)),
            ],
            out_specs=pl.BlockSpec((TB, CP), lambda i: (i, 0)),
        ),
        compiler_params=pltpu.CompilerParams(
            dimension_semantics=("parallel",),
            vmem_limit_bytes=_vmem_limit_bytes(TB, CP),
        ),
    )(x2d, w1p, w2p, w3p)

    return out_padded[:B, :num_classes]


def init_params(key, num_classes=10, dtype=jnp.float32):
    """Deterministic init matching nn.Linear shapes (no bias).

    PyTorch weight shapes: fc1 (600, 784), fc2 (100, 600), fc3 (C, 100).
    We store the transposes (in, out) for direct x @ W use.
    """
    k1, k2, k3 = jax.random.split(key, 3)

    def linear_init_t(k, out_f, in_f):
        # nn.Linear default init: U(-1/sqrt(in_f), 1/sqrt(in_f))
        bound = 1.0 / jnp.sqrt(jnp.asarray(in_f, dtype))
        w = jax.random.uniform(k, (out_f, in_f), dtype, -bound, bound)
        return w.T  # stored as (in, out)

    w1 = linear_init_t(k1, HIDDEN1, IN_FEATURES)
    w2 = linear_init_t(k2, HIDDEN2, HIDDEN1)
    w3 = linear_init_t(k3, num_classes, HIDDEN2)
    return w1, w2, w3


if __name__ == "__main__":
    key = jax.random.PRNGKey(0)
    k_x, k_p = jax.random.split(key)

    B, num_classes = 8, 10
    x = jax.random.normal(k_x, (B, 1, 28, 28), jnp.float32)  # NCHW MNIST-like
    w1, w2, w3 = init_params(k_p, num_classes=num_classes)

    # One-time weight staging (hoisted out of the forward, per perf review).
    w1p, w2p, w3p, C = jax.block_until_ready(prepare_weights(w1, w2, w3))

    fwd = jax.jit(mnist_fully_connected_forward, static_argnums=(4,))
    out = jax.block_until_ready(fwd(x, w1p, w2p, w3p, C))

    # Reference in plain JAX, using the same bf16 rounding of operands
    # (kernel accumulates in f32, so results should match closely).
    bf = lambda a: a.astype(jnp.bfloat16).astype(jnp.float32)
    xr = bf(x.reshape(-1, IN_FEATURES))
    h = jnp.maximum(xr @ bf(w1), 0.0)
    h = jnp.maximum(bf(h) @ bf(w2), 0.0)
    ref = bf(h) @ bf(w3)

    assert out.shape == (B, num_classes)
    assert jnp.allclose(out, ref, atol=2e-2, rtol=2e-2), float(jnp.max(jnp.abs(out - ref)))

    print("KERNEL_OK")
</pallas_src>

<mosaic_0001>
module attributes {stable_mosaic.version = 11 : i64} {
  func.func @mlp_kernel(%arg0: i32, %arg1: memref<8x784xf32, #tpu.memory_space<vmem>>, %arg2: memref<784x640xbf16, #tpu.memory_space<vmem>>, %arg3: memref<640x128xbf16, #tpu.memory_space<vmem>>, %arg4: memref<128x128xbf16, #tpu.memory_space<vmem>>, %arg5: memref<8x128xf32, #tpu.memory_space<vmem>>) attributes {dimension_semantics = [#tpu.dimension_semantics<parallel>], iteration_bounds = array<i64: 1>, scalar_prefetch = 0 : i64, scratch_operands = 0 : i64, tpu.core_type = #tpu.core_type<tc>, window_params = [{transform_indices = @transform_0, window_bounds = array<i64: 8, 784>}, {pipeline_mode = #tpu.pipeline_mode<synchronous>, transform_indices = @transform_1, window_bounds = array<i64: 784, 640>}, {pipeline_mode = #tpu.pipeline_mode<synchronous>, transform_indices = @transform_2, window_bounds = array<i64: 640, 128>}, {pipeline_mode = #tpu.pipeline_mode<synchronous>, transform_indices = @transform_3, window_bounds = array<i64: 128, 128>}, {transform_indices = @transform_4, window_bounds = array<i64: 8, 128>}]} {
    %c0 = arith.constant 0 : index
    %c0_0 = arith.constant 0 : index
    %0 = vector.load %arg1[%c0, %c0_0] : memref<8x784xf32, #tpu.memory_space<vmem>>, vector<8x784xf32>
    %1 = arith.truncf %0 : vector<8x784xf32> to vector<8x784xbf16>
    %c0_1 = arith.constant 0 : index
    %c0_2 = arith.constant 0 : index
    %2 = vector.load %arg2[%c0_1, %c0_2] : memref<784x640xbf16, #tpu.memory_space<vmem>>, vector<784x640xbf16>
    %cst = arith.constant dense<0.000000e+00> : vector<8x640xf32>
    %3 = tpu.matmul %1, %2, %cst {dimension_numbers = #tpu.dot_dimension_numbers<[1], [0], [0], [1], [0, 0, 1, 1], [], []>} : vector<8x784xbf16>, vector<784x640xbf16>, vector<8x640xf32> -> vector<8x640xf32>
    %cst_3 = arith.constant 0.000000e+00 : f32
    %4 = vector.broadcast %cst_3 : f32 to vector<8x640xf32>
    %5 = arith.maximumf %3, %4 : vector<8x640xf32>
    %6 = arith.truncf %5 : vector<8x640xf32> to vector<8x640xbf16>
    %c0_4 = arith.constant 0 : index
    %c0_5 = arith.constant 0 : index
    %7 = vector.load %arg3[%c0_4, %c0_5] : memref<640x128xbf16, #tpu.memory_space<vmem>>, vector<640x128xbf16>
    %cst_6 = arith.constant dense<0.000000e+00> : vector<8x128xf32>
    %8 = tpu.matmul %6, %7, %cst_6 {dimension_numbers = #tpu.dot_dimension_numbers<[1], [0], [0], [1], [0, 0, 1, 1], [], []>} : vector<8x640xbf16>, vector<640x128xbf16>, vector<8x128xf32> -> vector<8x128xf32>
    %cst_7 = arith.constant 0.000000e+00 : f32
    %9 = vector.broadcast %cst_7 : f32 to vector<8x128xf32>
    %10 = arith.maximumf %8, %9 : vector<8x128xf32>
    %11 = arith.truncf %10 : vector<8x128xf32> to vector<8x128xbf16>
    %c0_8 = arith.constant 0 : index
    %c0_9 = arith.constant 0 : index
    %12 = vector.load %arg4[%c0_8, %c0_9] : memref<128x128xbf16, #tpu.memory_space<vmem>>, vector<128x128xbf16>
    %cst_10 = arith.constant dense<0.000000e+00> : vector<8x128xf32>
    %13 = tpu.matmul %11, %12, %cst_10 {dimension_numbers = #tpu.dot_dimension_numbers<[1], [0], [0], [1], [0, 0, 1, 1], [], []>} : vector<8x128xbf16>, vector<128x128xbf16>, vector<8x128xf32> -> vector<8x128xf32>
    %c0_11 = arith.constant 0 : index
    %c0_12 = arith.constant 0 : index
    %14 = vector.load %arg5[%c0_11, %c0_12] : memref<8x128xf32, #tpu.memory_space<vmem>>, vector<8x128xf32>
    tpu.vector_store %arg5[%c0_11, %c0_12], %13 {strides = array<i32>} : memref<8x128xf32, #tpu.memory_space<vmem>>, vector<8x128xf32>,
    return
  }
  func.func @transform_0(%arg0: i32) -> (i32, i32) {
    %c0_i32 = arith.constant 0 : i32
    %c0_i32_0 = arith.constant 0 : i32
    return %arg0, %c0_i32 : i32, i32
  }
  func.func @transform_1(%arg0: i32) -> (i32, i32) {
    %c0_i32 = arith.constant 0 : i32
    %c0_i32_0 = arith.constant 0 : i32
    %c0_i32_1 = arith.constant 0 : i32
    return %c0_i32, %c0_i32_0 : i32, i32
  }
  func.func @transform_2(%arg0: i32) -> (i32, i32) {
    %c0_i32 = arith.constant 0 : i32
    %c0_i32_0 = arith.constant 0 : i32
    %c0_i32_1 = arith.constant 0 : i32
    return %c0_i32, %c0_i32_0 : i32, i32
  }
  func.func @transform_3(%arg0: i32) -> (i32, i32) {
    %c0_i32 = arith.constant 0 : i32
    %c0_i32_0 = arith.constant 0 : i32
    %c0_i32_1 = arith.constant 0 : i32
    return %c0_i32, %c0_i32_0 : i32, i32
  }
  func.func @transform_4(%arg0: i32) -> (i32, i32) {
    %c0_i32 = arith.constant 0 : i32
    %c0_i32_0 = arith.constant 0 : i32
    return %arg0, %c0_i32 : i32, i32
  }
}

</mosaic_0001>

<bundles_post_ra>
// kernel: mnist_fully_connected_forward.1
= control target key start
LH: loop header
LB: loop body
LE: loop exit
PB: predicated region body
PF: predicated region fallthrough
CT: control target
= control target key end

     0   :  { %9 = vsyncpa [#allocation3], 0  ;;  %s3909_s0 = inlined_call_operand.vmem [shape: f32[8,784], index: 0, kind: input, shape index: {}]   ;;  %s3910_s1 = inlined_call_operand.hbm [shape: bf16[784,640], index: 1, kind: input, shape index: {}]   ;;  %s3911_s2 = inlined_call_operand.vmem [shape: bf16[640,128], index: 2, kind: input, shape index: {}]   ;;  %s3912_s3 = inlined_call_operand.vmem [shape: bf16[128,128], index: 3, kind: input, shape index: {}]   ;;  %s3913_s4 = inlined_call_operand.hbm [shape: f32[8,128], index: 4, kind: output, shape index: {}]  }
   0x1   :  { %10 = vsyncpa [#allocation4], 0  ;;  %s3619_s15 = smov [#allocation2]   ;;  %s3571_s19 = scalar_lea.hbm %s3910_s1, 31360 }
   0x2   :  { %s18_s16 = sshll.u32 %s3619_s15, 4  ;;  %p3572_p0 = scmp.ne.s32.totalorder %s3910_s1, %s3571_s19  ;;  %s19_s16 = int_to_ptr.vmem [resolvable:$true] %s18_s16 }
   0x3   :  { %p3575_p1 = scmp.lt.u32.totalorder %s3571_s19, %s3910_s1 }
   0x5   :  { %p3577_p2 = pnand %p3575_p1, %p3572_p0 }
   0x7   :  { %3580 = shalt.err (!%p3577_p2)
}
   0x8   :  { %s3581_s24 = scalar_lea.vmem %s19_s16, 31360  ;;  %p3586_p4 = scmp.lt.s32.totalorder %s19_s16, %s19_s16 }
   0x9   :  { %p3582_p3 = scmp.ne.s32.totalorder %s19_s16, %s3581_s24  ;;  %p3587_p5 = scmp.lt.s32.totalorder %s3581_s24, %s3581_s24 }
   0xb   :  { %p3588_p6 = por %p3587_p5, %p3586_p4 }
   0xd   :  { %p3589_p7 = pnand %p3588_p6, %p3582_p3 }
   0xf   :  { %3592 = shalt.err (!%p3589_p7)
}
  0x10   :  { %s3620_s25 = smov 320   ;;  %s3621_s26 = smov 20  }
  0x11   :  { %24 = dma.hbm_to_vmem [thread:$0]  %s3910_s1, 31360, %s19_s16, [#allocation3], %s3620_s25, %s3620_s25, %s3621_s26  }
  0x12   :  { %3615 = dma.done.wait [#allocation3], 31360  }
  0x13   :  { %3616 = vsyncadd [#allocation3], 4294935936  ;;  %v3622_v0 = vmov 0   ;;  %v3180_v1 = vld [vmem:[#allocation2 + $0x4] ss:$20 sps:$4 sm:$0xff]   ;;  %v39_v9 = vld [vmem:[%s3909_s0 + $0x30] sm:$0xff] }
  0x14   :  { %1774 = vmatprep.mubr.bf16.mxu1 %v3622_v0  ;;  %v3182_v2 = vld [vmem:[#allocation2 + $0x784] ss:$20 sps:$4 sm:$0xff]   ;;  %1619 = vmatprep.subr.bf16.mxu0 %v3180_v1  ;;  %v3184_v3 = vld [vmem:[#allocation2] ss:$20 sps:$4 sm:$0xff]   ;;  %v3188_v6 = vld [vmem:[#allocation2 + $0x8] ss:$20 sps:$4 sm:$0xff]   ;;  %v3667_v10 = vpack.c.bf16 %v39_v9, %v39_v9 }
  0x15   :  { %v3185_v4 = vld [vmem:[#allocation2 + $0x780] ss:$20 sps:$4 sm:$0xff]   ;;  %1742 = vmatprep.subr.bf16.mxu1 %v3182_v2  ;;  %1620 = vmatpush1.bf16.msra.mxu0 %v3184_v3  ;;  %v3191_v8 = vld [vmem:[#allocation2 + $0x28] ss:$20 sps:$4 sm:$0xff]   ;;  %vm1615_vm0 = vcmask 130048   ;;  %vm3624_vm1 = vmmov 0  }
  0x16   :  { %v3186_v5 = vld [vmem:[#allocation2 + $0x2c] ss:$20 sps:$4 sm:$0xff]   ;;  %1743 = vmatpush1.bf16.msra.mxu1 %v3185_v4  ;;  %v3192_v11 = vld [vmem:[#allocation2 + $0x54] ss:$20 sps:$4 sm:$0xff]   ;;  %v3194_v12 = vld [vmem:[#allocation2 + $0x30] ss:$20 sps:$4 sm:$0xff]  }
  0x17   :  { %v3190_v7 = vld [vmem:[#allocation2 + $0xc] ss:$20 sps:$4 sm:$0xff]   ;;  %1621 = vmatprep.subr.bf16.mxu0 %v3186_v5  ;;  %v3196_v13 = vld [vmem:[#allocation2 + $0x34] ss:$20 sps:$4 sm:$0xff]   ;;  %v3197_v14 = vld [vmem:[#allocation2 + $0x50] ss:$20 sps:$4 sm:$0xff]  }
  0x18   :  { %1783 = vmatprep.subr.bf16.mxu1 %v3190_v7  ;;  %v3198_v15 = vld [vmem:[#allocation2 + $0x7c] ss:$20 sps:$4 sm:$0xff]   ;;  %v3203_v17 = vld [vmem:[#allocation2 + $0x78] ss:$20 sps:$4 sm:$0xff]   ;;  %v3206_v21 = vld [vmem:[#allocation2 + $0x80] ss:$20 sps:$4 sm:$0xff]  }
  0x19   :  { %1622 = vmatpush1.bf16.msra.mxu0 %v3191_v8  ;;  %2924 = vmatmul.mubr.msk.bf16.vlgmr.msra.gmra.mrb[0].mxu1 %vm1615_vm0, %v3667_v10  ;;  %v3202_v16 = vld [vmem:[#allocation2 + $0x5c] ss:$20 sps:$4 sm:$0xff]   ;;  %v3200_v18 = vld [vmem:[#allocation2 + $0x58] ss:$20 sps:$4 sm:$0xff]   ;;  %v3209_v22 = vld [vmem:[#allocation2 + $0xa0] ss:$20 sps:$4 sm:$0xff]  }
  0x1a   :  { %1784 = vmatpush1.bf16.msra.mxu1 %v3188_v6  ;;  %1623 = vmatprep.subr.bf16.mxu0 %v3192_v11  ;;  %v3204_v19 = vld [vmem:[#allocation2 + $0xa4] ss:$20 sps:$4 sm:$0xff]   ;;  %v3210_v23 = vld [vmem:[#allocation2 + $0xcc] ss:$20 sps:$4 sm:$0xff]   ;;  %v3215_v25 = vld [vmem:[#allocation2 + $0xc8] ss:$20 sps:$4 sm:$0xff]  }
  0x1b   :  { %1785 = vmatprep.subr.bf16.mxu1 %v3196_v13  ;;  %v3208_v20 = vld [vmem:[#allocation2 + $0x84] ss:$20 sps:$4 sm:$0xff]   ;;  %v3214_v24 = vld [vmem:[#allocation2 + $0xac] ss:$20 sps:$4 sm:$0xff]   ;;  %v3212_v26 = vld [vmem:[#allocation2 + $0xa8] ss:$20 sps:$4 sm:$0xff]  }
  0x1c   :  { %v3216_v27 = vld [vmem:[#allocation2 + $0xf4] ss:$20 sps:$4 sm:$0xff]   ;;  %v3218_v29 = vld [vmem:[#allocation2 + $0xd0] ss:$20 sps:$4 sm:$0xff]   ;;  %v3227_v33 = vld [vmem:[#allocation2 + $0x118] ss:$20 sps:$4 sm:$0xff]  }
  0x1d   :  { %1624 = vmatpush1.bf16.msra.mxu0 %v3197_v14  ;;  %v3220_v28 = vld [vmem:[#allocation2 + $0xd4] ss:$20 sps:$4 sm:$0xff]   ;;  %v3221_v30 = vld [vmem:[#allocation2 + $0xf0] ss:$20 sps:$4 sm:$0xff]   ;;  %v3224_v34 = vld [vmem:[#allocation2 + $0xf8] ss:$20 sps:$4 sm:$0xff]  }
  0x1e   :  { %1786 = vmatpush1.bf16.msra.mxu1 %v3194_v12  ;;  %1625 = vmatprep.subr.bf16.mxu0 %v3198_v15  ;;  %v3222_v31 = vld [vmem:[#allocation2 + $0x11c] ss:$20 sps:$4 sm:$0xff]   ;;  %v3228_v35 = vld [vmem:[#allocation2 + $0x144] ss:$20 sps:$4 sm:$0xff]   ;;  %v3230_v37 = vld [vmem:[#allocation2 + $0x120] ss:$20 sps:$4 sm:$0xff]  }
  0x1f   :  { %1787 = vmatprep.subr.bf16.mxu1 %v3202_v16  ;;  %v3226_v32 = vld [vmem:[#allocation2 + $0xfc] ss:$20 sps:$4 sm:$0xff]   ;;  %v3232_v36 = vld [vmem:[#allocation2 + $0x124] ss:$20 sps:$4 sm:$0xff]   ;;  %v3233_v38 = vld [vmem:[#allocation2 + $0x140] ss:$20 sps:$4 sm:$0xff]  }
  0x20   :  { %v3234_v39 = vld [vmem:[#allocation2 + $0x16c] ss:$20 sps:$4 sm:$0xff]   ;;  %v3239_v41 = vld [vmem:[#allocation2 + $0x168] ss:$20 sps:$4 sm:$0xff]   ;;  %v3242_v45 = vld [vmem:[#allocation2 + $0x170] ss:$20 sps:$4 sm:$0xff]  }
  0x21   :  { %1626 = vmatpush1.bf16.msra.mxu0 %v3203_v17  ;;  %v3238_v40 = vld [vmem:[#allocation2 + $0x14c] ss:$20 sps:$4 sm:$0xff]   ;;  %v3236_v42 = vld [vmem:[#allocation2 + $0x148] ss:$20 sps:$4 sm:$0xff]   ;;  %v3245_v46 = vld [vmem:[#allocation2 + $0x190] ss:$20 sps:$4 sm:$0xff]  }
  0x22   :  { %1788 = vmatpush1.bf16.msra.mxu1 %v3200_v18  ;;  %1627 = vmatprep.subr.bf16.mxu0 %v3204_v19  ;;  %v3240_v43 = vld [vmem:[#allocation2 + $0x194] ss:$20 sps:$4 sm:$0xff]   ;;  %v3246_v47 = vld [vmem:[#allocation2 + $0x1bc] ss:$20 sps:$4 sm:$0xff]   ;;  %v3251_v50 = vld [vmem:[#allocation2 + $0x1b8] ss:$20 sps:$4 sm:$0xff]  }
  0x23   :  { %1789 = vmatprep.subr.bf16.mxu1 %v3208_v20  ;;  %v3244_v44 = vld [vmem:[#allocation2 + $0x174] ss:$20 sps:$4 sm:$0xff]   ;;  %v3250_v48 = vld [vmem:[#allocation2 + $0x19c] ss:$20 sps:$4 sm:$0xff]   ;;  %v3248_v52 = vld [vmem:[#allocation2 + $0x198] ss:$20 sps:$4 sm:$0xff]  }
  0x24   :  { %v34_v49 = vld [vmem:[%s3909_s0 + $0x8] sm:$0xff]  ;;  %v3252_v53 = vld [vmem:[#allocation2 + $0x1e4] ss:$20 sps:$4 sm:$0xff]   ;;  %v3254_v55 = vld [vmem:[#allocation2 + $0x1c0] ss:$20 sps:$4 sm:$0xff]  }
  0x25   :  { %1628 = vmatpush1.bf16.msra.mxu0 %v3209_v22  ;;  %v3674_v51 = vpack.c.bf16 %v34_v49, %v34_v49  ;;  %v3256_v54 = vld [vmem:[#allocation2 + $0x1c4] ss:$20 sps:$4 sm:$0xff]   ;;  %v3257_v56 = vld [vmem:[#allocation2 + $0x1e0] ss:$20 sps:$4 sm:$0xff]   ;;  %v3260_v59 = vld [vmem:[#allocation2 + $0x1e8] ss:$20 sps:$4 sm:$0xff]  }
  0x26   :  { %1790 = vmatpush1.bf16.msra.mxu1 %v3206_v21  ;;  %1629 = vmatprep.subr.bf16.mxu0 %v3210_v23  ;;  %v3258_v57 = vld [vmem:[#allocation2 + $0x20c] ss:$20 sps:$4 sm:$0xff]   ;;  %v3263_v60 = vld [vmem:[#allocation2 + $0x208] ss:$20 sps:$4 sm:$0xff]   ;;  %v3266_v63 = vld [vmem:[#allocation2 + $0x210] ss:$20 sps:$4 sm:$0xff]  }
  0x27   :  { %1791 = vmatprep.subr.bf16.mxu1 %v3214_v24  ;;  %1651 = vmatprep.mubr.bf16.mxu0 %v3674_v51  ;;  %v3262_v58 = vld [vmem:[#allocation2 + $0x1ec] ss:$20 sps:$4 sm:$0xff]   ;;  %v3264_v61 = vld [vmem:[#allocation2 + $0x234] ss:$20 sps:$4 sm:$0xff]   ;;  %v3269_v1 = vld [vmem:[#allocation2 + $0x230] ss:$20 sps:$4 sm:$0xff]  }
  0x28   :  { %1815 = vmatprep.mubr.bf16.mxu1 %v3674_v51  ;;  %v3268_v62 = vld [vmem:[#allocation2 + $0x214] ss:$20 sps:$4 sm:$0xff]   ;;  %v3270_v2 = vld [vmem:[#allocation2 + $0x25c] ss:$20 sps:$4 sm:$0xff]   ;;  %v3272_v4 = vld [vmem:[#allocation2 + $0x238] ss:$20 sps:$4 sm:$0xff]  }
  0x29   :  { %1630 = vmatpush1.bf16.msra.mxu0 %v3215_v25  ;;  %v3274_v3 = vld [vmem:[#allocation2 + $0x23c] ss:$20 sps:$4 sm:$0xff]   ;;  %v3275_v5 = vld [vmem:[#allocation2 + $0x258] ss:$20 sps:$4 sm:$0xff]   ;;  %v33_v6 = vld [vmem:[%s3909_s0] sm:$0xff] }
  0x2a   :  { %1792 = vmatpush1.bf16.msra.mxu1 %v3212_v26  ;;  %1631 = vmatprep.subr.bf16.mxu0 %v3216_v27  ;;  %v3278_v7 = vld [vmem:[#allocation2 + $0x284] ss:$20 sps:$4 sm:$0xff]   ;;  %v3681_v9 = vpack.c.bf16 %v33_v6, %v33_v6  ;;  %v3276_v11 = vld [vmem:[#allocation2 + $0x280] ss:$20 sps:$4 sm:$0xff]   ;;  %v3282_v15 = vld [vmem:[#allocation2 + $0x2a8] ss:$20 sps:$4 sm:$0xff]  }
  0x2b   :  { %1793 = vmatprep.subr.bf16.mxu1 %v3220_v28  ;;  %v3281_v8 = vld [vmem:[#allocation2 + $0x264] ss:$20 sps:$4 sm:$0xff]   ;;  %v3279_v12 = vld [vmem:[#allocation2 + $0x260] ss:$20 sps:$4 sm:$0xff]   ;;  %v3285_v16 = vld [vmem:[#allocation2 + $0x288] ss:$20 sps:$4 sm:$0xff]  }
  0x2c   :  { %v3284_v13 = vld [vmem:[#allocation2 + $0x2ac] ss:$20 sps:$4 sm:$0xff]   ;;  %v3290_v17 = vld [vmem:[#allocation2 + $0x2d4] ss:$20 sps:$4 sm:$0xff]   ;;  %v3288_v19 = vld [vmem:[#allocation2 + $0x2d0] ss:$20 sps:$4 sm:$0xff]  }
  0x2d   :  { %1632 = vmatpush1.bf16.msra.mxu0 %v3221_v30  ;;  %v3287_v14 = vld [vmem:[#allocation2 + $0x28c] ss:$20 sps:$4 sm:$0xff]   ;;  %v3293_v18 = vld [vmem:[#allocation2 + $0x2b4] ss:$20 sps:$4 sm:$0xff]   ;;  %v3291_v20 = vld [vmem:[#allocation2 + $0x2b0] ss:$20 sps:$4 sm:$0xff]  }
  0x2e   :  { %1794 = vmatpush1.bf16.msra.mxu1 %v3218_v29  ;;  %1633 = vmatprep.subr.bf16.mxu0 %v3222_v31  ;;  %v3296_v21 = vld [vmem:[#allocation2 + $0x2fc] ss:$20 sps:$4 sm:$0xff]   ;;  %v3294_v23 = vld [vmem:[#allocation2 + $0x2f8] ss:$20 sps:$4 sm:$0xff]   ;;  %v3300_v27 = vld [vmem:[#allocation2 + $0x320] ss:$20 sps:$4 sm:$0xff]  }
  0x2f   :  { %1795 = vmatprep.subr.bf16.mxu1 %v3226_v32  ;;  %v3299_v22 = vld [vmem:[#allocation2 + $0x2dc] ss:$20 sps:$4 sm:$0xff]   ;;  %v3297_v24 = vld [vmem:[#allocation2 + $0x2d8] ss:$20 sps:$4 sm:$0xff]   ;;  %v3303_v28 = vld [vmem:[#allocation2 + $0x300] ss:$20 sps:$4 sm:$0xff]  }
  0x30   :  { %v3302_v25 = vld [vmem:[#allocation2 + $0x324] ss:$20 sps:$4 sm:$0xff]   ;;  %v3308_v29 = vld [vmem:[#allocation2 + $0x34c] ss:$20 sps:$4 sm:$0xff]   ;;  %v3306_v31 = vld [vmem:[#allocation2 + $0x348] ss:$20 sps:$4 sm:$0xff]  }
  0x31   :  { %1634 = vmatpush1.bf16.msra.mxu0 %v3227_v33  ;;  %v3305_v26 = vld [vmem:[#allocation2 + $0x304] ss:$20 sps:$4 sm:$0xff]   ;;  %v3311_v30 = vld [vmem:[#allocation2 + $0x32c] ss:$20 sps:$4 sm:$0xff]   ;;  %v3309_v32 = vld [vmem:[#allocation2 + $0x328] ss:$20 sps:$4 sm:$0xff]  }
  0x32   :  { %1796 = vmatpush1.bf16.msra.mxu1 %v3224_v34  ;;  %1635 = vmatprep.subr.bf16.mxu0 %v3228_v35  ;;  %v3314_v33 = vld [vmem:[#allocation2 + $0x374] ss:$20 sps:$4 sm:$0xff]   ;;  %v36_v35 = vld [vmem:[%s3909_s0 + $0x18] sm:$0xff] }
  0x33   :  { %1797 = vmatprep.subr.bf16.mxu1 %v3232_v36  ;;  %v3317_v34 = vld [vmem:[#allocation2 + $0x354] ss:$20 sps:$4 sm:$0xff]   ;;  %v3688_v36 = vpack.c.bf16 %v36_v35, %v36_v35  ;;  %v3398_v35 = vld [vmem:[#allocation2 + $0x5a4] ss:$20 sps:$4 sm:$0xff]  }
  0x34   :  { %v3330_v49 = vld [vmem:[#allocation2 + $0x3e8] ss:$20 sps:$4 sm:$0xff]  }
  0x35   :  { %1636 = vmatpush1.bf16.msra.mxu0 %v3233_v38  ;;  %v3315_v38 = vld [vmem:[#allocation2 + $0x350] ss:$20 sps:$4 sm:$0xff]   ;;  %v3365_v6 = vld [vmem:[#allocation2 + $0x494] ss:$20 sps:$4 sm:$0xff]  }
  0x36   :  { %1798 = vmatpush1.bf16.msra.mxu1 %v3230_v37  ;;  %1637 = vmatprep.subr.bf16.mxu0 %v3234_v39  ;;  %v3312_v37 = vld [vmem:[#allocation2 + $0x370] ss:$20 sps:$4 sm:$0xff]  }
  0x37   :  { %1799 = vmatprep.subr.bf16.mxu1 %v3238_v40  ;;  %v3320_v39 = vld [vmem:[#allocation2 + $0x39c] ss:$20 sps:$4 sm:$0xff]  }
  0x38   :  { %v3323_v40 = vld [vmem:[#allocation2 + $0x37c] ss:$20 sps:$4 sm:$0xff]  }
  0x39   :  { %1638 = vmatpush1.bf16.msra.mxu0 %v3239_v41  ;;  %v3318_v41 = vld [vmem:[#allocation2 + $0x398] ss:$20 sps:$4 sm:$0xff]  }
  0x3a   :  { %1800 = vmatpush1.bf16.msra.mxu1 %v3236_v42  ;;  %1639 = vmatprep.subr.bf16.mxu0 %v3240_v43  ;;  %v3321_v42 = vld [vmem:[#allocation2 + $0x378] ss:$20 sps:$4 sm:$0xff]  }
  0x3b   :  { %1801 = vmatprep.subr.bf16.mxu1 %v3244_v44  ;;  %v3326_v43 = vld [vmem:[#allocation2 + $0x3c4] ss:$20 sps:$4 sm:$0xff]  }
  0x3c   :  { %v3329_v44 = vld [vmem:[#allocation2 + $0x3a4] ss:$20 sps:$4 sm:$0xff]  }
  0x3d   :  { %1640 = vmatpush1.bf16.msra.mxu0 %v3245_v46  ;;  %v3327_v46 = vld [vmem:[#allocation2 + $0x3a0] ss:$20 sps:$4 sm:$0xff]  }
  0x3e   :  { %1802 = vmatpush1.bf16.msra.mxu1 %v3242_v45  ;;  %1641 = vmatprep.subr.bf16.mxu0 %v3246_v47  ;;  %v3324_v45 = vld [vmem:[#allocation2 + $0x3c0] ss:$20 sps:$4 sm:$0xff]  }
  0x3f   :  { %1803 = vmatprep.subr.bf16.mxu1 %v3250_v48  ;;  %v3332_v47 = vld [vmem:[#allocation2 + $0x3ec] ss:$20 sps:$4 sm:$0xff]  }
  0x40   :  { %v3335_v48 = vld [vmem:[#allocation2 + $0x3cc] ss:$20 sps:$4 sm:$0xff]  }
  0x41   :  { %1642 = vmatpush1.bf16.msra.mxu0 %v3251_v50  ;;  %v3333_v50 = vld [vmem:[#allocation2 + $0x3c8] ss:$20 sps:$4 sm:$0xff]  }
  0x42   :  { %1804 = vmatpush1.bf16.msra.mxu1 %v3248_v52  ;;  %1643 = vmatprep.subr.bf16.mxu0 %v3252_v53  ;;  %v3338_v52 = vld [vmem:[#allocation2 + $0x414] ss:$20 sps:$4 sm:$0xff]  }
  0x43   :  { %1805 = vmatprep.subr.bf16.mxu1 %v3256_v54  ;;  %v3341_v53 = vld [vmem:[#allocation2 + $0x3f4] ss:$20 sps:$4 sm:$0xff]   ;;  %v3336_v54 = vld [vmem:[#allocation2 + $0x410] ss:$20 sps:$4 sm:$0xff]  }
  0x45   :  { %1644 = vmatpush1.bf16.msra.mxu0 %v3257_v56  ;;  %v3344_v56 = vld [vmem:[#allocation2 + $0x43c] ss:$20 sps:$4 sm:$0xff]  }
  0x46   :  { %1806 = vmatpush1.bf16.msra.mxu1 %v3254_v55  ;;  %1645 = vmatprep.subr.bf16.mxu0 %v3258_v57  ;;  %v3339_v55 = vld [vmem:[#allocation2 + $0x3f0] ss:$20 sps:$4 sm:$0xff]  }
  0x47   :  { %1807 = vmatprep.subr.bf16.mxu1 %v3262_v58  ;;  %v3347_v57 = vld [vmem:[#allocation2 + $0x41c] ss:$20 sps:$4 sm:$0xff]   ;;  %v3342_v58 = vld [vmem:[#allocation2 + $0x438] ss:$20 sps:$4 sm:$0xff]  }
  0x49   :  { %1646 = vmatpush1.bf16.msra.mxu0 %v3263_v60  ;;  %v3350_v60 = vld [vmem:[#allocation2 + $0x464] ss:$20 sps:$4 sm:$0xff]  }
  0x4a   :  { %1808 = vmatpush1.bf16.msra.mxu1 %v3260_v59  ;;  %1647 = vmatprep.subr.bf16.mxu0 %v3264_v61  ;;  %v3345_v59 = vld [vmem:[#allocation2 + $0x418] ss:$20 sps:$4 sm:$0xff]  }
  0x4b   :  { %1809 = vmatprep.subr.bf16.mxu1 %v3268_v62  ;;  %v3353_v61 = vld [vmem:[#allocation2 + $0x444] ss:$20 sps:$4 sm:$0xff]   ;;  %v3348_v62 = vld [vmem:[#allocation2 + $0x460] ss:$20 sps:$4 sm:$0xff]  }
  0x4d   :  { %1648 = vmatpush1.bf16.msra.mxu0 %v3269_v1  ;;  %v3356_v1 = vld [vmem:[#allocation2 + $0x48c] ss:$20 sps:$4 sm:$0xff]  }
  0x4e   :  { %1810 = vmatpush1.bf16.msra.mxu1 %v3266_v63  ;;  %1649 = vmatprep.subr.bf16.mxu0 %v3270_v2  ;;  %v3351_v63 = vld [vmem:[#allocation2 + $0x440] ss:$20 sps:$4 sm:$0xff]  }
  0x4f   :  { %1811 = vmatprep.subr.bf16.mxu1 %v3274_v3  ;;  %v3359_v2 = vld [vmem:[#allocation2 + $0x46c] ss:$20 sps:$4 sm:$0xff]   ;;  %v3354_v3 = vld [vmem:[#allocation2 + $0x488] ss:$20 sps:$4 sm:$0xff]  }
  0x51   :  { %1650 = vmatpush1.bf16.msra.mxu0 %v3275_v5  ;;  %v3362_v5 = vld [vmem:[#allocation2 + $0x4b4] ss:$20 sps:$4 sm:$0xff]  }
  0x52   :  { %1812 = vmatpush1.bf16.msra.mxu1 %v3272_v4  ;;  %1660 = vmatprep.subr.bf16.mxu0 %v3278_v7  ;;  %v3357_v4 = vld [vmem:[#allocation2 + $0x468] ss:$20 sps:$4 sm:$0xff]   ;;  %v3360_v7 = vld [vmem:[#allocation2 + $0x4b0] ss:$20 sps:$4 sm:$0xff]  }
  0x53   :  { %1813 = vmatprep.subr.bf16.mxu1 %v3281_v8  ;;  %v3363_v8 = vld [vmem:[#allocation2 + $0x490] ss:$20 sps:$4 sm:$0xff]  }
  0x54   :  { %1652 = vmatmul.mubr.bf16.vlgmr.msra.gmra.mrb[0].mxu0 %v3681_v9 }
  0x55   :  { %1661 = vmatpush1.bf16.msra.mxu0 %v3276_v11  ;;  %1692 = vmatprep.mubr.bf16.mxu0 %v3688_v36  ;;  %v3368_v11 = vld [vmem:[#allocation2 + $0x4dc] ss:$20 sps:$4 sm:$0xff]  }
  0x56   :  { %1814 = vmatpush1.bf16.msra.mxu1 %v3279_v12  ;;  %1662 = vmatprep.subr.bf16.mxu0 %v3284_v13  ;;  %v3371_v12 = vld [vmem:[#allocation2 + $0x4bc] ss:$20 sps:$4 sm:$0xff]   ;;  %v3366_v13 = vld [vmem:[#allocation2 + $0x4d8] ss:$20 sps:$4 sm:$0xff]  }
  0x57   :  { %1824 = vmatprep.subr.bf16.mxu1 %v3287_v14  ;;  %v35_v14 = vld [vmem:[%s3909_s0 + $0x10] sm:$0xff] }
  0x59   :  { %1663 = vmatpush1.bf16.msra.mxu0 %v3282_v15  ;;  %1816 = vmatmul.mubr.bf16.vlgmr.msra.gmra.mrb[4].mxu1 %v3681_v9  ;;  %v3369_v15 = vld [vmem:[#allocation2 + $0x4b8] ss:$20 sps:$4 sm:$0xff]  }
  0x5a   :  { %1825 = vmatpush1.bf16.msra.mxu1 %v3285_v16  ;;  %1664 = vmatprep.subr.bf16.mxu0 %v3290_v17  ;;  %v3374_v16 = vld [vmem:[#allocation2 + $0x504] ss:$20 sps:$4 sm:$0xff]  }
  0x5b   :  { %1826 = vmatprep.subr.bf16.mxu1 %v3293_v18  ;;  %1856 = vmatprep.mubr.bf16.mxu1 %v3688_v36  ;;  %v3377_v17 = vld [vmem:[#allocation2 + $0x4e4] ss:$20 sps:$4 sm:$0xff]   ;;  %v3695_v18 = vpack.c.bf16 %v35_v14, %v35_v14  ;;  %v3450_v14 = vld [vmem:[#allocation2 + $0x708] ss:$20 sps:$4 sm:$0xff]  }
  0x5d   :  { %1665 = vmatpush1.bf16.msra.mxu0 %v3288_v19  ;;  %v3372_v19 = vld [vmem:[#allocation2 + $0x500] ss:$20 sps:$4 sm:$0xff]  }
  0x5e   :  { %1827 = vmatpush1.bf16.msra.mxu1 %v3291_v20  ;;  %1666 = vmatprep.subr.bf16.mxu0 %v3296_v21  ;;  %v3375_v20 = vld [vmem:[#allocation2 + $0x4e0] ss:$20 sps:$4 sm:$0xff]  }
  0x5f   :  { %1828 = vmatprep.subr.bf16.mxu1 %v3299_v22  ;;  %v3380_v21 = vld [vmem:[#allocation2 + $0x52c] ss:$20 sps:$4 sm:$0xff]  }
  0x60   :  { %v38_v22 = vld [vmem:[%s3909_s0 + $0x28] sm:$0xff] }
  0x61   :  { %1667 = vmatpush1.bf16.msra.mxu0 %v3294_v23  ;;  %v3383_v23 = vld [vmem:[#allocation2 + $0x50c] ss:$20 sps:$4 sm:$0xff]  }
  0x62   :  { %1829 = vmatpush1.bf16.msra.mxu1 %v3297_v24  ;;  %1668 = vmatprep.subr.bf16.mxu0 %v3302_v25  ;;  %v3700_v24 = vpack.c.bf16 %v38_v22, %v38_v22  ;;  %v3378_v25 = vld [vmem:[#allocation2 + $0x528] ss:$20 sps:$4 sm:$0xff]   ;;  %v3462_v22 = vld [vmem:[#allocation2 + $0x758] ss:$20 sps:$4 sm:$0xff]  }
  0x63   :  { %1830 = vmatprep.subr.bf16.mxu1 %v3305_v26  ;;  %v3381_v26 = vld [vmem:[#allocation2 + $0x508] ss:$20 sps:$4 sm:$0xff]  }
  0x65   :  { %1669 = vmatpush1.bf16.msra.mxu0 %v3300_v27  ;;  %v3386_v27 = vld [vmem:[#allocation2 + $0x554] ss:$20 sps:$4 sm:$0xff]  }
  0x66   :  { %1831 = vmatpush1.bf16.msra.mxu1 %v3303_v28  ;;  %1670 = vmatprep.subr.bf16.mxu0 %v3308_v29  ;;  %v3389_v28 = vld [vmem:[#allocation2 + $0x534] ss:$20 sps:$4 sm:$0xff]   ;;  %v3384_v29 = vld [vmem:[#allocation2 + $0x550] ss:$20 sps:$4 sm:$0xff]  }
  0x67   :  { %1832 = vmatprep.subr.bf16.mxu1 %v3311_v30  ;;  %v3387_v30 = vld [vmem:[#allocation2 + $0x530] ss:$20 sps:$4 sm:$0xff]  }
  0x69   :  { %1671 = vmatpush1.bf16.msra.mxu0 %v3306_v31  ;;  %v3392_v31 = vld [vmem:[#allocation2 + $0x57c] ss:$20 sps:$4 sm:$0xff]  }
  0x6a   :  { %1833 = vmatpush1.bf16.msra.mxu1 %v3309_v32  ;;  %1672 = vmatprep.subr.bf16.mxu0 %v3314_v33  ;;  %v3395_v32 = vld [vmem:[#allocation2 + $0x55c] ss:$20 sps:$4 sm:$0xff]   ;;  %v3390_v33 = vld [vmem:[#allocation2 + $0x578] ss:$20 sps:$4 sm:$0xff]  }
  0x6b   :  { %1834 = vmatprep.subr.bf16.mxu1 %v3317_v34  ;;  %v3393_v34 = vld [vmem:[#allocation2 + $0x558] ss:$20 sps:$4 sm:$0xff]  }
  0x6d   :  { %1673 = vmatpush1.bf16.msra.mxu0 %v3312_v37  ;;  %v3401_v37 = vld [vmem:[#allocation2 + $0x584] ss:$20 sps:$4 sm:$0xff]  }
  0x6e   :  { %1835 = vmatpush1.bf16.msra.mxu1 %v3315_v38  ;;  %1674 = vmatprep.subr.bf16.mxu0 %v3320_v39  ;;  %v3396_v38 = vld [vmem:[#allocation2 + $0x5a0] ss:$20 sps:$4 sm:$0xff]  }
  0x6f   :  { %1836 = vmatprep.subr.bf16.mxu1 %v3323_v40  ;;  %v3399_v39 = vld [vmem:[#allocation2 + $0x580] ss:$20 sps:$4 sm:$0xff]  }
  0x70   :  { %v3404_v40 = vld [vmem:[#allocation2 + $0x5cc] ss:$20 sps:$4 sm:$0xff]  }
  0x71   :  { %1675 = vmatpush1.bf16.msra.mxu0 %v3318_v41  ;;  %v3407_v41 = vld [vmem:[#allocation2 + $0x5ac] ss:$20 sps:$4 sm:$0xff]  }
  0x72   :  { %1837 = vmatpush1.bf16.msra.mxu1 %v3321_v42  ;;  %1676 = vmatprep.subr.bf16.mxu0 %v3326_v43  ;;  %v3402_v42 = vld [vmem:[#allocation2 + $0x5c8] ss:$20 sps:$4 sm:$0xff]  }
  0x73   :  { %1838 = vmatprep.subr.bf16.mxu1 %v3329_v44  ;;  %v3405_v43 = vld [vmem:[#allocation2 + $0x5a8] ss:$20 sps:$4 sm:$0xff]  }
  0x74   :  { %v3410_v44 = vld [vmem:[#allocation2 + $0x5f4] ss:$20 sps:$4 sm:$0xff]  }
  0x75   :  { %1677 = vmatpush1.bf16.msra.mxu0 %v3324_v45  ;;  %v3413_v45 = vld [vmem:[#allocation2 + $0x5d4] ss:$20 sps:$4 sm:$0xff]  }
  0x76   :  { %1839 = vmatpush1.bf16.msra.mxu1 %v3327_v46  ;;  %1678 = vmatprep.subr.bf16.mxu0 %v3332_v47  ;;  %v3408_v46 = vld [vmem:[#allocation2 + $0x5f0] ss:$20 sps:$4 sm:$0xff]  }
  0x77   :  { %1840 = vmatprep.subr.bf16.mxu1 %v3335_v48  ;;  %v3411_v47 = vld [vmem:[#allocation2 + $0x5d0] ss:$20 sps:$4 sm:$0xff]  }
  0x78   :  { %v3416_v48 = vld [vmem:[#allocation2 + $0x61c] ss:$20 sps:$4 sm:$0xff]  }
  0x79   :  { %1679 = vmatpush1.bf16.msra.mxu0 %v3330_v49  ;;  %v3419_v49 = vld [vmem:[#allocation2 + $0x5fc] ss:$20 sps:$4 sm:$0xff]  }
  0x7a   :  { %1841 = vmatpush1.bf16.msra.mxu1 %v3333_v50  ;;  %1680 = vmatprep.subr.bf16.mxu0 %v3338_v52  ;;  %v3414_v50 = vld [vmem:[#allocation2 + $0x618] ss:$20 sps:$4 sm:$0xff]  }
  0x7b   :  { %1842 = vmatprep.subr.bf16.mxu1 %v3341_v53  ;;  %v3417_v52 = vld [vmem:[#allocation2 + $0x5f8] ss:$20 sps:$4 sm:$0xff]  }
  0x7c   :  { %v3422_v53 = vld [vmem:[#allocation2 + $0x644] ss:$20 sps:$4 sm:$0xff]  }
  0x7d   :  { %1681 = vmatpush1.bf16.msra.mxu0 %v3336_v54  ;;  %v3425_v54 = vld [vmem:[#allocation2 + $0x624] ss:$20 sps:$4 sm:$0xff]  }
  0x7e   :  { %1843 = vmatpush1.bf16.msra.mxu1 %v3339_v55  ;;  %1682 = vmatprep.subr.bf16.mxu0 %v3344_v56  ;;  %v3420_v55 = vld [vmem:[#allocation2 + $0x640] ss:$20 sps:$4 sm:$0xff]  }
  0x7f   :  { %1844 = vmatprep.subr.bf16.mxu1 %v3347_v57  ;;  %v3423_v56 = vld [vmem:[#allocation2 + $0x620] ss:$20 sps:$4 sm:$0xff]  }
  0x80   :  { %v3428_v57 = vld [vmem:[#allocation2 + $0x66c] ss:$20 sps:$4 sm:$0xff]  }
  0x81   :  { %1683 = vmatpush1.bf16.msra.mxu0 %v3342_v58  ;;  %v3431_v58 = vld [vmem:[#allocation2 + $0x64c] ss:$20 sps:$4 sm:$0xff]  }
  0x82   :  { %1845 = vmatpush1.bf16.msra.mxu1 %v3345_v59  ;;  %1684 = vmatprep.subr.bf16.mxu0 %v3350_v60  ;;  %v3426_v59 = vld [vmem:[#allocation2 + $0x668] ss:$20 sps:$4 sm:$0xff]  }
  0x83   :  { %1846 = vmatprep.subr.bf16.mxu1 %v3353_v61  ;;  %v3429_v60 = vld [vmem:[#allocation2 + $0x648] ss:$20 sps:$4 sm:$0xff]  }
  0x84   :  { %v3434_v61 = vld [vmem:[#allocation2 + $0x694] ss:$20 sps:$4 sm:$0xff]  }
  0x85   :  { %1685 = vmatpush1.bf16.msra.mxu0 %v3348_v62  ;;  %v3437_v62 = vld [vmem:[#allocation2 + $0x674] ss:$20 sps:$4 sm:$0xff]  }
  0x86   :  { %1847 = vmatpush1.bf16.msra.mxu1 %v3351_v63  ;;  %1686 = vmatprep.subr.bf16.mxu0 %v3356_v1  ;;  %v3432_v63 = vld [vmem:[#allocation2 + $0x690] ss:$20 sps:$4 sm:$0xff]  }
  0x87   :  { %1848 = vmatprep.subr.bf16.mxu1 %v3359_v2  ;;  %v3435_v1 = vld [vmem:[#allocation2 + $0x670] ss:$20 sps:$4 sm:$0xff]  }
  0x88   :  { %v3440_v2 = vld [vmem:[#allocation2 + $0x6bc] ss:$20 sps:$4 sm:$0xff]  }
  0x89   :  { %1687 = vmatpush1.bf16.msra.mxu0 %v3354_v3  ;;  %v3443_v3 = vld [vmem:[#allocation2 + $0x69c] ss:$20 sps:$4 sm:$0xff]  }
  0x8a   :  { %1849 = vmatpush1.bf16.msra.mxu1 %v3357_v4  ;;  %1688 = vmatprep.subr.bf16.mxu0 %v3362_v5  ;;  %v3438_v4 = vld [vmem:[#allocation2 + $0x6b8] ss:$20 sps:$4 sm:$0xff]  }
  0x8b   :  { %1850 = vmatprep.subr.bf16.mxu1 %v3365_v6  ;;  %v3441_v5 = vld [vmem:[#allocation2 + $0x698] ss:$20 sps:$4 sm:$0xff]  }
  0x8c   :  { %v3446_v6 = vld [vmem:[#allocation2 + $0x6e4] ss:$20 sps:$4 sm:$0xff]  }
  0x8d   :  { %1689 = vmatpush1.bf16.msra.mxu0 %v3360_v7  ;;  %v3449_v7 = vld [vmem:[#allocation2 + $0x6c4] ss:$20 sps:$4 sm:$0xff]  }
  0x8e   :  { %1851 = vmatpush1.bf16.msra.mxu1 %v3363_v8  ;;  %1690 = vmatprep.subr.bf16.mxu0 %v3368_v11  ;;  %v3444_v8 = vld [vmem:[#allocation2 + $0x6e0] ss:$20 sps:$4 sm:$0xff]  }
  0x8f   :  { %1852 = vmatprep.subr.bf16.mxu1 %v3371_v12  ;;  %v3447_v11 = vld [vmem:[#allocation2 + $0x6c0] ss:$20 sps:$4 sm:$0xff]  }
  0x90   :  { %v3452_v12 = vld [vmem:[#allocation2 + $0x70c] ss:$20 sps:$4 sm:$0xff]  }
  0x91   :  { %1691 = vmatpush1.bf16.msra.mxu0 %v3366_v13  ;;  %v3455_v13 = vld [vmem:[#allocation2 + $0x6ec] ss:$20 sps:$4 sm:$0xff]  }
  0x92   :  { %1853 = vmatpush1.bf16.msra.mxu1 %v3369_v15  ;;  %1701 = vmatprep.subr.bf16.mxu0 %v3374_v16  ;;  %v3453_v15 = vld [vmem:[#allocation2 + $0x6e8] ss:$20 sps:$4 sm:$0xff]  }
  0x93   :  { %1854 = vmatprep.subr.bf16.mxu1 %v3377_v17  ;;  %v3458_v16 = vld [vmem:[#allocation2 + $0x734] ss:$20 sps:$4 sm:$0xff]  }
  0x94   :  { %1693 = vmatmul.mubr.bf16.vlgmr.msra.gmra.mrb[0].mxu0 %v3695_v18  ;;  %v3461_v17 = vld [vmem:[#allocation2 + $0x714] ss:$20 sps:$4 sm:$0xff]  }
  0x95   :  { %1702 = vmatpush1.bf16.msra.mxu0 %v3372_v19  ;;  %1733 = vmatprep.mubr.bf16.mxu0 %v3700_v24  ;;  %v3456_v19 = vld [vmem:[#allocation2 + $0x730] ss:$20 sps:$4 sm:$0xff]  }
  0x96   :  { %1855 = vmatpush1.bf16.msra.mxu1 %v3375_v20  ;;  %1703 = vmatprep.subr.bf16.mxu0 %v3380_v21  ;;  %v3459_v20 = vld [vmem:[#allocation2 + $0x710] ss:$20 sps:$4 sm:$0xff]  }
  0x97   :  { %1865 = vmatprep.subr.bf16.mxu1 %v3383_v23  ;;  %v3464_v21 = vld [vmem:[#allocation2 + $0x75c] ss:$20 sps:$4 sm:$0xff]  }
  0x98   :  { %v3467_v23 = vld [vmem:[#allocation2 + $0x73c] ss:$20 sps:$4 sm:$0xff]  }
  0x99   :  { %1704 = vmatpush1.bf16.msra.mxu0 %v3378_v25  ;;  %1857 = vmatmul.mubr.bf16.vlgmr.msra.gmra.mrb[4].mxu1 %v3695_v18  ;;  %v3465_v25 = vld [vmem:[#allocation2 + $0x738] ss:$20 sps:$4 sm:$0xff]  }
  0x9a   :  { %1866 = vmatpush1.bf16.msra.mxu1 %v3381_v26  ;;  %1705 = vmatprep.subr.bf16.mxu0 %v3386_v27  ;;  %v37_v26 = vld [vmem:[%s3909_s0 + $0x20] sm:$0xff] }
  0x9b   :  { %1867 = vmatprep.subr.bf16.mxu1 %v3389_v28  ;;  %1897 = vmatprep.mubr.bf16.mxu1 %v3700_v24  ;;  %v3471_v27 = vld [vmem:[#allocation2 + $0x150] ss:$20 sps:$4 sm:$0xff]  }
  0x9c   :  { %v3470_v28 = vld [vmem:[#allocation2 + $0x764] ss:$20 sps:$4 sm:$0xff]  }
  0x9d   :  { %1706 = vmatpush1.bf16.msra.mxu0 %v3384_v29  ;;  %v3709_v29 = vpack.c.bf16 %v37_v26, %v37_v26  ;;  %v3526_v26 = vld [vmem:[%s3911_s2 + $0x8] sm:$0xff]  }
  0x9e   :  { %1868 = vmatpush1.bf16.msra.mxu1 %v3387_v30  ;;  %1707 = vmatprep.subr.bf16.mxu0 %v3392_v31  ;;  %v3468_v30 = vld [vmem:[#allocation2 + $0x760] ss:$20 sps:$4 sm:$0xff]   ;;  %v3472_v31 = vld [vmem:[#allocation2 + $0x10] ss:$20 sps:$4 sm:$0xff]  }
  0x9f   :  { %1869 = vmatprep.subr.bf16.mxu1 %v3395_v32  ;;  %v3473_v32 = vld [vmem:[#allocation2 + $0x178] ss:$20 sps:$4 sm:$0xff]  }
  0xa1   :  { %1708 = vmatpush1.bf16.msra.mxu0 %v3390_v33  ;;  %v3479_v33 = vld [vmem:[#allocation2 + $0x78c] ss:$20 sps:$4 sm:$0xff]  }
  0xa2   :  { %1870 = vmatpush1.bf16.msra.mxu1 %v3393_v34  ;;  %1709 = vmatprep.subr.bf16.mxu0 %v3398_v35  ;;  %v3474_v34 = vld [vmem:[#allocation2 + $0x38] ss:$20 sps:$4 sm:$0xff]   ;;  %v3475_v35 = vld [vmem:[#allocation2 + $0x1a0] ss:$20 sps:$4 sm:$0xff]  }
  0xa3   :  { %1871 = vmatprep.subr.bf16.mxu1 %v3401_v37  ;;  %v3477_v37 = vld [vmem:[#allocation2 + $0x788] ss:$20 sps:$4 sm:$0xff]  }
  0xa5   :  { %1710 = vmatpush1.bf16.msra.mxu0 %v3396_v38  ;;  %v3476_v38 = vld [vmem:[#allocation2 + $0x60] ss:$20 sps:$4 sm:$0xff]  }
  0xa6   :  { %1872 = vmatpush1.bf16.msra.mxu1 %v3399_v39  ;;  %1711 = vmatprep.subr.bf16.mxu0 %v3404_v40  ;;  %v3482_v39 = vld [vmem:[#allocation2 + $0x3d0] ss:$20 sps:$4 sm:$0xff]   ;;  %v3480_v40 = vld [vmem:[#allocation2 + $0x1c8] ss:$20 sps:$4 sm:$0xff]  }
  0xa7   :  { %1873 = vmatprep.subr.bf16.mxu1 %v3407_v41  ;;  %v3481_v41 = vld [vmem:[#allocation2 + $0x88] ss:$20 sps:$4 sm:$0xff]  }
  0xa9   :  { %1712 = vmatpush1.bf16.msra.mxu0 %v3402_v42  ;;  %v3483_v42 = vld [vmem:[#allocation2 + $0x1f0] ss:$20 sps:$4 sm:$0xff]  }
  0xaa   :  { %1874 = vmatpush1.bf16.msra.mxu1 %v3405_v43  ;;  %1713 = vmatprep.subr.bf16.mxu0 %v3410_v44  ;;  %v3484_v43 = vld [vmem:[#allocation2 + $0x290] ss:$20 sps:$4 sm:$0xff]   ;;  %v3487_v44 = vld [vmem:[#allocation2 + $0x218] ss:$20 sps:$4 sm:$0xff]  }
  0xab   :  { %1875 = vmatprep.subr.bf16.mxu1 %v3413_v45  ;;  %v3486_v45 = vld [vmem:[#allocation2 + $0x3f8] ss:$20 sps:$4 sm:$0xff]  }
  0xad   :  { %1714 = vmatpush1.bf16.msra.mxu0 %v3408_v46  ;;  %v3489_v46 = vld [vmem:[#allocation2 + $0xd8] ss:$20 sps:$4 sm:$0xff]  }
  0xae   :  { %1876 = vmatpush1.bf16.msra.mxu1 %v3411_v47  ;;  %1715 = vmatprep.subr.bf16.mxu0 %v3416_v48  ;;  %v3488_v47 = vld [vmem:[#allocation2 + $0x2b8] ss:$20 sps:$4 sm:$0xff]   ;;  %v3491_v48 = vld [vmem:[#allocation2 + $0x240] ss:$20 sps:$4 sm:$0xff]  }
  0xaf   :  { %1877 = vmatprep.subr.bf16.mxu1 %v3419_v49  ;;  %v3490_v49 = vld [vmem:[#allocation2 + $0x420] ss:$20 sps:$4 sm:$0xff]  }
  0xb1   :  { %1716 = vmatpush1.bf16.msra.mxu0 %v3414_v50  ;;  %v3492_v50 = vld [vmem:[#allocation2 + $0x2e0] ss:$20 sps:$4 sm:$0xff]  }
  0xb2   :  { %1878 = vmatpush1.bf16.msra.mxu1 %v3417_v52  ;;  %1717 = vmatprep.subr.bf16.mxu0 %v3422_v53  ;;  %v3495_v52 = vld [vmem:[#allocation2 + $0x268] ss:$20 sps:$4 sm:$0xff]  }
  0xb3   :  { %1879 = vmatprep.subr.bf16.mxu1 %v3425_v54  ;;  %v3494_v53 = vld [vmem:[#allocation2 + $0x448] ss:$20 sps:$4 sm:$0xff]  }
  0xb5   :  { %1718 = vmatpush1.bf16.msra.mxu0 %v3420_v55  ;;  %v3497_v55 = vld [vmem:[#allocation2 + $0x128] ss:$20 sps:$4 sm:$0xff]  }
  0xb6   :  { %1880 = vmatpush1.bf16.msra.mxu1 %v3423_v56  ;;  %1719 = vmatprep.subr.bf16.mxu0 %v3428_v57  ;;  %v3496_v57 = vld [vmem:[#allocation2 + $0x308] ss:$20 sps:$4 sm:$0xff]  }
  0xb7   :  { %1881 = vmatprep.subr.bf16.mxu1 %v3431_v58  ;;  %v3500_v58 = vld [vmem:[#allocation2 + $0x650] ss:$20 sps:$4 sm:$0xff]  }
  0xb9   :  { %1720 = vmatpush1.bf16.msra.mxu0 %v3426_v59 }
  0xba   :  { %1882 = vmatpush1.bf16.msra.mxu1 %v3429_v60  ;;  %1721 = vmatprep.subr.bf16.mxu0 %v3434_v61  ;;  %v3501_v61 = vld [vmem:[#allocation2 + $0x510] ss:$20 sps:$4 sm:$0xff]  }
  0xbb   :  { %1883 = vmatprep.subr.bf16.mxu1 %v3437_v62  ;;  %v3499_v62 = vld [vmem:[#allocation2 + $0x330] ss:$20 sps:$4 sm:$0xff]  }
  0xbd   :  { %1722 = vmatpush1.bf16.msra.mxu0 %v3432_v63  ;;  %v3504_v63 = vld [vmem:[#allocation2 + $0x678] ss:$20 sps:$4 sm:$0xff]  }
  0xbe   :  { %1884 = vmatpush1.bf16.msra.mxu1 %v3435_v1  ;;  %1723 = vmatprep.subr.bf16.mxu0 %v3440_v2  ;;  %v3502_v1 = vld [vmem:[#allocation2 + $0x498] ss:$20 sps:$4 sm:$0xff]  }
  0xbf   :  { %1885 = vmatprep.subr.bf16.mxu1 %v3443_v3  ;;  %v3505_v2 = vld [vmem:[#allocation2 + $0x538] ss:$20 sps:$4 sm:$0xff]  }
  0xc0   :  { %v3503_v3 = vld [vmem:[#allocation2 + $0x358] ss:$20 sps:$4 sm:$0xff]  }
  0xc1   :  { %1724 = vmatpush1.bf16.msra.mxu0 %v3438_v4  ;;  %v3508_v4 = vld [vmem:[#allocation2 + $0x6a0] ss:$20 sps:$4 sm:$0xff]  }
  0xc2   :  { %1886 = vmatpush1.bf16.msra.mxu1 %v3441_v5  ;;  %1725 = vmatprep.subr.bf16.mxu0 %v3446_v6  ;;  %v3506_v5 = vld [vmem:[#allocation2 + $0x4c0] ss:$20 sps:$4 sm:$0xff]  }
  0xc3   :  { %1887 = vmatprep.subr.bf16.mxu1 %v3449_v7  ;;  %v3509_v6 = vld [vmem:[#allocation2 + $0x560] ss:$20 sps:$4 sm:$0xff]  }
  0xc4   :  { %v3507_v7 = vld [vmem:[#allocation2 + $0x380] ss:$20 sps:$4 sm:$0xff]  }
  0xc5   :  { %1726 = vmatpush1.bf16.msra.mxu0 %v3444_v8  ;;  %v3512_v8 = vld [vmem:[#allocation2 + $0x6c8] ss:$20 sps:$4 sm:$0xff]  }
  0xc6   :  { %1888 = vmatpush1.bf16.msra.mxu1 %v3447_v11  ;;  %1727 = vmatprep.subr.bf16.mxu0 %v3452_v12  ;;  %v3510_v11 = vld [vmem:[#allocation2 + $0x4e8] ss:$20 sps:$4 sm:$0xff]  }
  0xc7   :  { %1889 = vmatprep.subr.bf16.mxu1 %v3455_v13  ;;  %v3511_v12 = vld [vmem:[#allocation2 + $0x3a8] ss:$20 sps:$4 sm:$0xff]   ;;  %v3515_v13 = vld [vmem:[#allocation2 + $0x5b0] ss:$20 sps:$4 sm:$0xff]  }
  0xc9   :  { %1728 = vmatpush1.bf16.msra.mxu0 %v3450_v14  ;;  %v3516_v14 = vld [vmem:[#allocation2 + $0x718] ss:$20 sps:$4 sm:$0xff]  }
  0xca   :  { %1890 = vmatpush1.bf16.msra.mxu1 %v3453_v15  ;;  %1729 = vmatprep.subr.bf16.mxu0 %v3458_v16  ;;  %v3522_v15 = vld [vmem:[#allocation2 + $0x790] ss:$20 sps:$4 sm:$0xff]   ;;  %v3623_v16 = vmov 0.0  }
  0xcb   :  { %1891 = vmatprep.subr.bf16.mxu1 %v3461_v17  ;;  %v3523_v17 = vld [vmem:[%s3911_s2 + $0x40] sm:$0xff]  }
  0xcd   :  { %1730 = vmatpush1.bf16.msra.mxu0 %v3456_v19  ;;  %v3517_v19 = vld [vmem:[#allocation2 + $0x5d8] ss:$20 sps:$4 sm:$0xff]  }
  0xce   :  { %1892 = vmatpush1.bf16.msra.mxu1 %v3459_v20  ;;  %1731 = vmatprep.subr.bf16.mxu0 %v3464_v21  ;;  %v3518_v20 = vld [vmem:[#allocation2 + $0x740] ss:$20 sps:$4 sm:$0xff]  }
  0xcf   :  { %1893 = vmatprep.subr.bf16.mxu1 %v3467_v23  ;;  %v3519_v21 = vld [vmem:[#allocation2 + $0x600] ss:$20 sps:$4 sm:$0xff]  }
  0xd0   :  { %v3524_v23 = vld [vmem:[%s3911_s2] sm:$0xff]  }
  0xd1   :  { %1732 = vmatpush1.bf16.msra.mxu0 %v3462_v22  ;;  %v3520_v22 = vld [vmem:[#allocation2 + $0x768] ss:$20 sps:$4 sm:$0xff]  }
  0xd2   :  { %1894 = vmatpush1.bf16.msra.mxu1 %v3465_v25  ;;  %2975 = vmatprep.subr.bf16.mxu0 %v3471_v27  ;;  %v3521_v25 = vld [vmem:[#allocation2 + $0x628] ss:$20 sps:$4 sm:$0xff]   ;;  %v3531_v27 = vld [vmem:[%s3911_s2 + $0xc0] sm:$0xff]  }
  0xd3   :  { %1895 = vmatprep.subr.bf16.mxu1 %v3470_v28  ;;  %v3527_v28 = vld [vmem:[%s3911_s2 + $0x50] sm:$0xff]  }
  0xd4   :  { %1734 = vmatmul.mubr.bf16.vlgmr.msra.gmra.mrb[0].mxu0 %v3709_v29 }
  0xd5   :  { %2976 = vmatpush3.bf16.msra.mxu0 %v3472_v31  ;;  %1979 = vmatprep.mubr.bf16.mxu0 %v3674_v51  ;;  %v3485_v51 = vld [vmem:[#allocation2 + $0xb0] ss:$20 sps:$4 sm:$0xff]   ;;  %v3535_v31 = vld [vmem:[%s3911_s2 + $0xc8] sm:$0xff]  }
  0xd6   :  { %1896 = vmatpush1.bf16.msra.mxu1 %v3468_v30  ;;  %2977 = vmatprep.subr.bf16.mxu0 %v3473_v32  ;;  %v3528_v30 = vld [vmem:[%s3911_s2 + $0x10] sm:$0xff]   ;;  %v3529_v32 = vld [vmem:[%s3911_s2 + $0x58] sm:$0xff]  }
  0xd7   :  { %1906 = vmatprep.subr.bf16.mxu1 %v3479_v33  ;;  %v3536_v33 = vld [vmem:[%s3911_s2 + $0x88] sm:$0xff]  }
  0xd9   :  { %1898 = vmatmul.mubr.bf16.vlgmr.msra.gmra.mrb[4].mxu1 %v3709_v29  ;;  %2978 = vmatpush3.bf16.msra.mxu0 %v3474_v34  ;;  %v3530_v34 = vld [vmem:[%s3911_s2 + $0x18] sm:$0xff]  }
  0xda   :  { %2979 = vmatprep.subr.bf16.mxu0 %v3475_v35  ;;  %1907 = vmatpush1.bf16.msra.mxu1 %v3477_v37  ;;  %v3539_v35 = vld [vmem:[%s3911_s2 + $0xd0] sm:$0xff]   ;;  %v3534_v37 = vld [vmem:[%s3911_s2 + $0x20] sm:$0xff]  }
  0xdb   :  { %1938 = vmatprep.mubr.bf16.mxu1 %v3622_v0  ;;  %2997 = vmatprep.subr.bf16.mxu1 %v3482_v39  ;;  %v3493_v0 = vld [vmem:[#allocation2 + $0x100] ss:$20 sps:$4 sm:$0xff]   ;;  %v3538_v39 = vld [vmem:[%s3911_s2 + $0x28] sm:$0xff]  }
  0xdd   :  { %2980 = vmatpush3.bf16.msra.mxu0 %v3476_v38  ;;  %v3537_v38 = vld [vmem:[%s3911_s2 + $0x68] sm:$0xff]  }
  0xde   :  { %2981 = vmatprep.subr.bf16.mxu0 %v3480_v40  ;;  %v3540_v40 = vld [vmem:[%s3911_s2 + $0x90] sm:$0xff]  }
  0xe1   :  { %2982 = vmatpush3.bf16.msra.mxu0 %v3481_v41  ;;  %v3541_v41 = vld [vmem:[%s3911_s2 + $0x70] sm:$0xff]  }
  0xe2   :  { %2983 = vmatprep.subr.bf16.mxu0 %v3483_v42  ;;  %v3542_v42 = vld [vmem:[%s3911_s2 + $0x30] sm:$0xff]  }
  0xe5   :  { %2925 = vmatmul.mubr.msk.bf16.vlgmr.msra.gmra.mrb[4].mxu1 %vm1615_vm0, %v3667_v10  ;;  %2984 = vmatpush3.bf16.msra.mxu0 %v3485_v51  ;;  %v3543_v51 = vld [vmem:[%s3911_s2 + $0xd8] sm:$0xff]  }
  0xe6   :  { %2998 = vmatpush3.bf16.msra.mxu1 %v3484_v43  ;;  %2985 = vmatprep.subr.bf16.mxu0 %v3487_v44  ;;  %v3544_v43 = vld [vmem:[%s3911_s2 + $0x98] sm:$0xff]  }
  0xe7   :  { %2999 = vmatprep.subr.bf16.mxu1 %v3486_v45  ;;  %2019 = vmatprep.mubr.bf16.mxu1 %v3688_v36  ;;  %v3498_v36 = vld [vmem:[#allocation2 + $0x470] ss:$20 sps:$4 sm:$0xff]   ;;  %v3545_v44 = vld [vmem:[%s3911_s2 + $0x78] sm:$0xff]  }
  0xe8   :  { %v3546_v45 = vld [vmem:[%s3911_s2 + $0x38] sm:$0xff]  }
  0xe9   :  { %2986 = vmatpush3.bf16.msra.mxu0 %v3489_v46  ;;  %v3547_v46 = vld [vmem:[%s3911_s2 + $0xe0] sm:$0xff]  }
  0xea   :  { %3000 = vmatpush3.bf16.msra.mxu1 %v3488_v47  ;;  %2987 = vmatprep.subr.bf16.mxu0 %v3491_v48  ;;  %v3548_v47 = vld [vmem:[%s3911_s2 + $0xa0] sm:$0xff]   ;;  %v3549_v48 = vld [vmem:[%s3911_s2 + $0xe8] sm:$0xff]  }
  0xeb   :  { %3001 = vmatprep.subr.bf16.mxu1 %v3490_v49  ;;  %v3550_v49 = vld [vmem:[%s3911_s2 + $0xa8] sm:$0xff]  }
  0xec   :  { %v3718_v54 = vpop.f32.mrb[0].mxu1 }
  0xed   :  { %2988 = vmatpush3.bf16.msra.mxu0 %v3493_v0  ;;  %v3720_v56 = vpop.f32.mrb[1].mxu1  ;;  %v3551_v0 = vld [vmem:[%s3911_s2 + $0xf0] sm:$0xff]  }
  0xee   :  { %3002 = vmatpush3.bf16.msra.mxu1 %v3492_v50  ;;  %2989 = vmatprep.subr.bf16.mxu0 %v3495_v52  ;;  %v1780_v59 = vpop.f32.mrb[2].mxu1  ;;  %v3552_v50 = vld [vmem:[%s3911_s2 + $0xb0] sm:$0xff]   ;;  %v3553_v52 = vld [vmem:[%s3911_s2 + $0xf8] sm:$0xff]  }
  0xef   :  { %3003 = vmatprep.subr.bf16.mxu1 %v3494_v53  ;;  %v1781_v60 = vpop.f32.mrb[3].mxu1  ;;  %v3554_v53 = vld [vmem:[%s3911_s2 + $0xb8] sm:$0xff]  }
  0xf1   :  { %2990 = vmatpush3.bf16.msra.mxu0 %v3497_v55 }
  0xf2   :  { %3004 = vmatpush3.bf16.msra.mxu1 %v3496_v57  ;;  %3019 = vmatprep.subr.bf16.mxu0 %v3500_v58 }
  0xf3   :  { %3005 = vmatprep.subr.bf16.mxu1 %v3498_v36 }
  0xf4   :  { %1980 = vmatmul.mubr.bf16.vlgmr.msra.gmra.mrb[4].mxu0 %v3681_v9  ;;  %v3513_v9 = vld [vmem:[#allocation2 + $0x588] ss:$20 sps:$4 sm:$0xff]  }
  0xf5   :  { %3020 = vmatpush3.bf16.msra.mxu0 %v3501_v61  ;;  %2059 = vmatprep.mubr.bf16.mxu0 %v3700_v24  ;;  %v3514_v24 = vld [vmem:[#allocation2 + $0x6f0] ss:$20 sps:$4 sm:$0xff]  }
  0xf6   :  { %3006 = vmatpush3.bf16.msra.mxu1 %v3499_v62  ;;  %3021 = vmatprep.subr.bf16.mxu0 %v3504_v63 }
  0xf7   :  { %3007 = vmatprep.subr.bf16.mxu1 %v3502_v1  ;;  %v3555_v1 = vld [vmem:[%s3911_s2 + $0x100] sm:$0xff]  }
  0xf9   :  { %3022 = vmatpush3.bf16.msra.mxu0 %v3505_v2 }
  0xfa   :  { %3008 = vmatpush3.bf16.msra.mxu1 %v3503_v3  ;;  %3023 = vmatprep.subr.bf16.mxu0 %v3508_v4 }
  0xfb   :  { %3009 = vmatprep.subr.bf16.mxu1 %v3506_v5 }
  0xfd   :  { %3024 = vmatpush3.bf16.msra.mxu0 %v3509_v6  ;;  %v3558_v6 = vld [vmem:[%s3911_s2 + $0x118] sm:$0xff]  }
  0xfe   :  { %3010 = vmatpush3.bf16.msra.mxu1 %v3507_v7  ;;  %3025 = vmatprep.subr.bf16.mxu0 %v3512_v8 }
  0xff   :  { %3011 = vmatprep.subr.bf16.mxu1 %v3510_v11 }
 0x101   :  { %3026 = vmatpush3.bf16.msra.mxu0 %v3513_v9 }
 0x102   :  { %3012 = vmatpush3.bf16.msra.mxu1 %v3511_v12  ;;  %3027 = vmatprep.subr.bf16.mxu0 %v3514_v24  ;;  %v3559_v24 = vld [vmem:[%s3911_s2 + $0x120] sm:$0xff]  }
 0x103   :  { %3105 = vmatprep.subr.bf16.mxu1 %v3623_v16 }
 0x105   :  { %2020 = vmatmul.mubr.bf16.vlgmr.msra.gmra.mrb[8].mxu1 %v3695_v18  ;;  %3028 = vmatpush3.bf16.msra.mxu0 %v3515_v13  ;;  %v3525_v18 = vld [vmem:[%s3911_s2 + $0x48] sm:$0xff]  }
 0x106   :  { %3029 = vmatprep.subr.bf16.mxu0 %v3516_v14  ;;  %3106 = vmatpush3.bf16.msra.mxu1 %v3522_v15  ;;  %v3560_v13 = vld [vmem:[%s3911_s2 + $0x128] sm:$0xff]   ;;  %v3561_v14 = vld [vmem:[%s3911_s2 + $0x130] sm:$0xff]  }
 0x107   :  { %3107 = vmatprep.mubr.msk.bf16.mxu1 %vm3624_vm1, %v3623_v16  ;;  %3043 = vmatprep.subr.bf16.mxu1 %v3523_v17 }
 0x109   :  { %3030 = vmatpush3.bf16.msra.mxu0 %v3517_v19 }
 0x10a   :  { %3031 = vmatprep.subr.bf16.mxu0 %v3518_v20 }
 0x10d   :  { %3032 = vmatpush3.bf16.msra.mxu0 %v3519_v21  ;;  %3108 = vmatmul.mubr.msk.bf16.vlgmr.msra.gmra.mrb[12].mxu1 %vm1615_vm0, %v3667_v10  ;;  %v3532_v10 = vld [vmem:[%s3911_s2 + $0x80] sm:$0xff]   ;;  %v3562_v21 = vld [vmem:[%s3911_s2 + $0x138] sm:$0xff]  }
 0x10e   :  { %3033 = vmatprep.subr.bf16.mxu0 %v3520_v22  ;;  %3044 = vmatpush3.bf16.msra.mxu1 %v3524_v23 }
 0x10f   :  { %3045 = vmatprep.subr.bf16.mxu1 %v3525_v18 }
 0x111   :  { %3034 = vmatpush3.bf16.msra.mxu0 %v3521_v25 }
 0x112   :  { %3046 = vmatpush3.bf16.msra.mxu1 %v3526_v26  ;;  %3065 = vmatprep.subr.bf16.mxu0 %v3531_v27 }
 0x113   :  { %3047 = vmatprep.subr.bf16.mxu1 %v3527_v28 }
 0x114   :  { %2060 = vmatmul.mubr.bf16.vlgmr.msra.gmra.mrb[8].mxu0 %v3709_v29  ;;  %v3533_v29 = vld [vmem:[%s3911_s2 + $0x60] sm:$0xff]  }
 0x115   :  { %3066 = vmatpush3.bf16.msra.mxu0 %v3532_v10 }
 0x116   :  { %3048 = vmatpush3.bf16.msra.mxu1 %v3528_v30  ;;  %3067 = vmatprep.subr.bf16.mxu0 %v3535_v31 }
 0x117   :  { %3049 = vmatprep.subr.bf16.mxu1 %v3529_v32 }
 0x119   :  { %3068 = vmatpush3.bf16.msra.mxu0 %v3536_v33 }
 0x11a   :  { %3050 = vmatpush3.bf16.msra.mxu1 %v3530_v34  ;;  %3069 = vmatprep.subr.bf16.mxu0 %v3539_v35 }
 0x11b   :  { %3051 = vmatprep.subr.bf16.mxu1 %v3533_v29 }
 0x11d   :  { %3070 = vmatpush3.bf16.msra.mxu0 %v3540_v40 }
 0x11e   :  { %3052 = vmatpush3.bf16.msra.mxu1 %v3534_v37  ;;  %3071 = vmatprep.subr.bf16.mxu0 %v3543_v51  ;;  %v3564_v51 = vld [vmem:[%s3912_s3 + $0x8] sm:$0xff]  }
 0x11f   :  { %3053 = vmatprep.subr.bf16.mxu1 %v3537_v38 }
 0x121   :  { %3072 = vmatpush3.bf16.msra.mxu0 %v3544_v43  ;;  %v3565_v43 = vld [vmem:[%s3912_s3 + $0x10] sm:$0xff]  }
 0x122   :  { %3054 = vmatpush3.bf16.msra.mxu1 %v3538_v39  ;;  %3073 = vmatprep.subr.bf16.mxu0 %v3547_v46  ;;  %v3568_v46 = vld [vmem:[%s3912_s3 + $0x28] sm:$0xff]  }
 0x123   :  { %3055 = vmatprep.subr.bf16.mxu1 %v3541_v41 }
 0x125   :  { %3074 = vmatpush3.bf16.msra.mxu0 %v3548_v47  ;;  %v3569_v47 = vld [vmem:[%s3912_s3 + $0x30] sm:$0xff]  }
 0x126   :  { %3056 = vmatpush3.bf16.msra.mxu1 %v3542_v42  ;;  %3075 = vmatprep.subr.bf16.mxu0 %v3549_v48  ;;  %v3563_v42 = vld [vmem:[%s3912_s3] sm:$0xff]   ;;  %v3570_v48 = vld [vmem:[%s3912_s3 + $0x38] sm:$0xff]  }
 0x127   :  { %3057 = vmatprep.subr.bf16.mxu1 %v3545_v44  ;;  %v3566_v44 = vld [vmem:[%s3912_s3 + $0x18] sm:$0xff]  }
 0x129   :  { %3076 = vmatpush3.bf16.msra.mxu0 %v3550_v49 }
 0x12a   :  { %3058 = vmatpush3.bf16.msra.mxu1 %v3546_v45  ;;  %3077 = vmatprep.subr.bf16.mxu0 %v3551_v0  ;;  %v3567_v45 = vld [vmem:[%s3912_s3 + $0x20] sm:$0xff]   ;;  %s3625_s3 = smov [#allocation5]  }
 0x12b   :  { %3111 = vmatprep.subr.bf16.mxu1 %v3623_v16  ;;  %s2670_s26 = sshll.u32 %s3625_s3, 4  ;;  %s2671_s26 = int_to_ptr.vmem [resolvable:$true] %s2670_s26 }
 0x12c   :  { %s3593_s27 = scalar_lea.vmem %s2671_s26, 128  ;;  %p3598_p9 = scmp.lt.s32.totalorder %s2671_s26, %s2671_s26 }
 0x12d   :  { %3078 = vmatpush3.bf16.msra.mxu0 %v3552_v50  ;;  %p3594_p8 = scmp.ne.s32.totalorder %s2671_s26, %s3593_s27  ;;  %p3599_p10 = scmp.lt.s32.totalorder %s3593_s27, %s3593_s27 }
 0x12e   :  { %3079 = vmatprep.subr.bf16.mxu0 %v3553_v52 }
 0x12f   :  { %p3600_p11 = por %p3599_p10, %p3598_p9 }
 0x131   :  { %3080 = vmatpush3.bf16.msra.mxu0 %v3554_v53  ;;  %p3601_p12 = pnand %p3600_p11, %p3594_p8 }
 0x132   :  { %3131 = vmatprep.subr.bf16.mxu0 %v3623_v16 }
 0x1a7   :  { %v1735_v55 = vpop.f32.mrb[0].mxu0 }
 0x1a8   :  { %v3151_v57 = vadd.f32 %v3718_v54, %v1735_v55  ;;  %v1737_v58 = vpop.f32.mrb[1].mxu0  ;;  %v3556_v54 = vld [vmem:[%s3911_s2 + $0x108] sm:$0xff]  }
 0x1a9   :  { %v3152_v59 = vadd.f32 %v3720_v56, %v1737_v58  ;;  %v1739_v36 = vpop.f32.mrb[2].mxu0  ;;  %v3557_v56 = vld [vmem:[%s3911_s2 + $0x110] sm:$0xff]  }
 0x1aa   :  { %v2107_v60 = vmax.f32 %v3151_v57, 0.0  ;;  %v1740_v61 = vpop.f32.mrb[3].mxu0 }
 0x1ab   :  { %v2108_v62 = vmax.f32 %v3152_v59, 0.0 }
 0x1ac   :  { %v2112_v2 = vpack.c.bf16 %v2107_v60, %v2107_v60 }
 0x1ad   :  { %v2113_v63 = vpack.c.bf16 %v2108_v62, %v2108_v62 }
 0x1af   :  { %2469 = vmatprep.mubr.bf16.mxu1 %v2113_v63 }
 0x1b0   :  { %2470 = vmatmul.mubr.bf16.vlgmr.msra.gmra.mrb[16].mxu1 %v2112_v2 }
 0x1b1   :  { %3112 = vmatpush3.bf16.msra.mxu1 %v3555_v1  ;;  %3127 = vmatprep.mubr.msk.bf16.mxu1 %vm3624_vm1, %v3623_v16 }
 0x1b2   :  { %3113 = vmatprep.subr.bf16.mxu1 %v3623_v16 }
 0x1b5   :  { %3114 = vmatpush3.bf16.msra.mxu1 %v3556_v54 }
 0x1b6   :  { %3115 = vmatprep.subr.bf16.mxu1 %v3623_v16 }
 0x1b8   :  { %v1940_v3 = vpop.f32.mrb[4].mxu1 }
 0x1b9   :  { %v2109_v4 = vmax.f32 %v1940_v3, 0.0  ;;  %v1942_v5 = vpop.f32.mrb[5].mxu1  ;;  %3116 = vmatpush3.bf16.msra.mxu1 %v3557_v56 }
 0x1ba   :  { %v2110_v7 = vmax.f32 %v1942_v5, 0.0  ;;  %v1944_v8 = vpop.f32.mrb[6].mxu1  ;;  %3117 = vmatprep.subr.bf16.mxu1 %v3623_v16 }
 0x1bb   :  { %v1945_v11 = vpop.f32.mrb[7].mxu1  ;;  %v2114_v12 = vpack.c.bf16 %v2109_v4, %v2109_v4 }
 0x1bc   :  { %v2115_v9 = vpack.c.bf16 %v2110_v7, %v2110_v7 }
 0x1bd   :  { %3118 = vmatpush3.bf16.msra.mxu1 %v3558_v6 }
 0x1be   :  { %2509 = vmatprep.mubr.bf16.mxu0 %v2115_v9  ;;  %3119 = vmatprep.subr.bf16.mxu1 %v3623_v16 }
 0x1bf   :  { %2510 = vmatmul.mubr.bf16.vlgmr.msra.gmra.mrb[12].mxu0 %v2114_v12 }
 0x1c0   :  { %3147 = vmatprep.mubr.msk.bf16.mxu0 %vm3624_vm1, %v3623_v16  ;;  %3132 = vmatpush3.bf16.msra.mxu0 %v3563_v42 }
 0x1c1   :  { %3120 = vmatpush3.bf16.msra.mxu1 %v3559_v24  ;;  %3133 = vmatprep.subr.bf16.mxu0 %v3623_v16 }
 0x1c2   :  { %3121 = vmatprep.subr.bf16.mxu1 %v3623_v16 }
 0x1c4   :  { %3134 = vmatpush3.bf16.msra.mxu0 %v3564_v51 }
 0x1c5   :  { %3122 = vmatpush3.bf16.msra.mxu1 %v3560_v13  ;;  %3135 = vmatprep.subr.bf16.mxu0 %v3623_v16 }
 0x1c6   :  { %3123 = vmatprep.subr.bf16.mxu1 %v3623_v16 }
 0x1c7   :  { %v2991_v15 = vpop.f32.mrb[4].mxu0 }
 0x1c8   :  { %v2992_v17 = vpop.f32.mrb[5].mxu0  ;;  %3136 = vmatpush3.bf16.msra.mxu0 %v3565_v43 }
 0x1c9   :  { %v2993_v19 = vadd.f32 %v2992_v17, %v2991_v15  ;;  %v2994_v20 = vpop.f32.mrb[6].mxu0  ;;  %3124 = vmatpush3.bf16.msra.mxu1 %v3561_v14  ;;  %3137 = vmatprep.subr.bf16.mxu0 %v3623_v16 }
 0x1ca   :  { %v2995_v22 = vpop.f32.mrb[7].mxu0  ;;  %3125 = vmatprep.subr.bf16.mxu1 %v3623_v16 }
 0x1cc   :  { %3138 = vmatpush3.bf16.msra.mxu0 %v3566_v44 }
 0x1cd   :  { %3126 = vmatpush3.bf16.msra.mxu1 %v3562_v21  ;;  %3139 = vmatprep.subr.bf16.mxu0 %v3623_v16 }
 0x1d0   :  { %3140 = vmatpush3.bf16.msra.mxu0 %v3567_v45 }
 0x1d1   :  { %3141 = vmatprep.subr.bf16.mxu0 %v3623_v16 }
 0x1d4   :  { %3142 = vmatpush3.bf16.msra.mxu0 %v3568_v46 }
 0x1d5   :  { %3143 = vmatprep.subr.bf16.mxu0 %v3623_v16 }
 0x1d8   :  { %v3013_v23 = vpop.f32.mrb[8].mxu1  ;;  %3144 = vmatpush3.bf16.msra.mxu0 %v3569_v47 }
 0x1d9   :  { %v3014_v18 = vpop.f32.mrb[9].mxu1  ;;  %3145 = vmatprep.subr.bf16.mxu0 %v3623_v16 }
 0x1da   :  { %v3015_v25 = vadd.f32 %v3014_v18, %v3013_v23  ;;  %v3016_v26 = vpop.f32.mrb[10].mxu1 }
 0x1db   :  { %v3017_v27 = vpop.f32.mrb[11].mxu1 }
 0x1dc   :  { %v2022_v28 = vadd.f32 %v3015_v25, %v2993_v19  ;;  %3146 = vmatpush3.bf16.msra.mxu0 %v3570_v48 }
 0x1e0   :  { %v2101_v10 = vpop.f32.mrb[12].mxu1 }
 0x1e1   :  { %v3109_v30 = vpop.f32.mrb[13].mxu1 }
 0x1e2   :  { %v2104_v31 = vpop.f32.mrb[14].mxu1 }
 0x1e3   :  { %v3110_v32 = vpop.f32.mrb[15].mxu1 }
 0x1e7   :  { %v3035_v33 = vpop.f32.mrb[8].mxu0 }
 0x1e8   :  { %v3036_v34 = vpop.f32.mrb[9].mxu0 }
 0x1e9   :  { %v3037_v35 = vadd.f32 %v3036_v34, %v3035_v33  ;;  %v3038_v29 = vpop.f32.mrb[10].mxu0 }
 0x1ea   :  { %v3039_v37 = vpop.f32.mrb[11].mxu0 }
 0x1eb   :  { %v2062_v38 = vadd.f32 %v3037_v35, %v2022_v28 }
 0x1ed   :  { %v2102_v39 = vadd.f32 %v2101_v10, %v2062_v38 }
 0x1ef   :  { %v2111_v40 = vmax.f32 %v2102_v39, 0.0 }
 0x1f1   :  { %v2116_v41 = vpack.c.bf16 %v2111_v40, %v2111_v40 }
 0x1f3   :  { %3128 = vmatmul.mubr.bf16.vlgmr.msra.gmra.mrb[20].mxu1 %v2116_v41 }
 0x283   :  { %v3059_v49 = vpop.f32.mrb[16].mxu1 }
 0x284   :  { %v3060_v0 = vpop.f32.mrb[17].mxu1 }
 0x285   :  { %v3061_v50 = vadd.f32 %v3060_v0, %v3059_v49  ;;  %v3062_v52 = vpop.f32.mrb[18].mxu1 }
 0x286   :  { %v3063_v53 = vpop.f32.mrb[19].mxu1 }
 0x292   :  { %v3081_v55 = vpop.f32.mrb[12].mxu0 }
 0x293   :  { %v3082_v57 = vpop.f32.mrb[13].mxu0 }
 0x294   :  { %v3083_v58 = vadd.f32 %v3082_v57, %v3081_v55  ;;  %v3084_v59 = vpop.f32.mrb[14].mxu0 }
 0x295   :  { %v3085_v36 = vpop.f32.mrb[15].mxu0 }
 0x296   :  { %v2512_v60 = vadd.f32 %v3083_v58, %v3061_v50 }
 0x2c6   :  { %v2551_v61 = vpop.f32.mrb[20].mxu1 }
 0x2c7   :  { %v2552_v62 = vadd.f32 %v2551_v61, %v2512_v60  ;;  %v3129_v63 = vpop.f32.mrb[21].mxu1 }
 0x2c8   :  { %v2554_v16 = vpop.f32.mrb[22].mxu1 }
 0x2c9   :  { %v2557_v1 = vmax.f32 %v2552_v62, 0.0  ;;  %v3130_v2 = vpop.f32.mrb[23].mxu1 }
 0x2cb   :  { %v2558_v54 = vpack.c.bf16 %v2557_v1, %v2557_v1 }
 0x2cd   :  { %3148 = vmatmul.mubr.bf16.vlgmr.msra.gmra.mrb[16].mxu0 %v2558_v54 }
 0x3a0   :  { %v2657_v56 = vpop.f32.mrb[16].mxu0 }
 0x3a1   :  { %2663 = vst [vmem:[#allocation5] sm:$0xff] %v2657_v56  ;;  %v3149_v3 = vpop.f32.mrb[17].mxu0 }
 0x3a2   :  { %v2660_v4 = vpop.f32.mrb[18].mxu0 }
 0x3a3   :  { %3604 = shalt.err (!%p3601_p12)
}
 0x3a4   :  { %s3605_s1 = scalar_lea.hbm %s3913_s4, 128 }
 0x3a5   :  { %p3606_p13 = scmp.ne.s32.totalorder %s3913_s4, %s3605_s1  ;;  %p3609_p0 = scmp.lt.u32.totalorder %s3605_s1, %s3913_s4 }
 0x3a7   :  { %p3611_p1 = pnand %p3609_p0, %p3606_p13 }
 0x3a9   :  { %3614 = shalt.err (!%p3611_p1)
}
 0x3aa   :  { %2673 = dma.vmem_to_hbm [thread:$0]  %s2671_s26, 128, %s3913_s4, [#allocation4]   ;;  %v3150_v5 = vpop.f32.mrb[19].mxu0 }
 0x3ab   :  { %3617 = dma.done.wait [#allocation4], 128  }
 0x3ac   :  { %3618 = vsyncadd [#allocation4], 4294967168 }
 0x3ad   :  { %2677 = vsyncpa [#allocation3], 1 }
 0x3ae   :  { %2678 = vsyncpa [#allocation4], 1 }

</bundles_post_ra>
